<compile_context>
chip_gen: v7x
topology: tpu7x:2x2x1
jax: 0.10.0
libtpu: 0.0.40
codegen_flags: <defaults>
</compile_context>

<pallas_src>
import functools

import jax
import jax.numpy as jnp
from jax.experimental import pallas as pl
from jax.experimental.pallas import tpu as pltpu


def head_kernel(x_ref, wqkv_ref, o_ref, *, head_size):
    B, T, C = x_ref.shape

    # ---- fused QKV projection: fold batch into rows, one bf16 MXU matmul ----
    x_rows = x_ref[...].reshape(B * T, C).astype(jnp.bfloat16)
    wqkv = wqkv_ref[...].astype(jnp.bfloat16)
    qkv = jnp.dot(x_rows, wqkv, preferred_element_type=jnp.float32)  # (B*T, 3hs)
    qkv = qkv.reshape(B, T, 3 * head_size)
    q = qkv[:, :, 0 * head_size:1 * head_size]
    k = qkv[:, :, 1 * head_size:2 * head_size]
    v = qkv[:, :, 2 * head_size:3 * head_size]

    # ---- causal attention scores (contract last dim; no explicit transpose) ----
    scale = head_size ** -0.5
    s = jnp.einsum("bqd,bkd->bqk",
                   q.astype(jnp.bfloat16), k.astype(jnp.bfloat16),
                   preferred_element_type=jnp.float32) * scale

    row = jax.lax.broadcasted_iota(jnp.int32, (T, T), 0)
    col = jax.lax.broadcasted_iota(jnp.int32, (T, T), 1)
    s = jnp.where((row >= col)[None, :, :], s, -1e30)  # finite mask, no NaN risk

    # ---- softmax kept in float32 ----
    s = s - jnp.max(s, axis=-1, keepdims=True)
    p = jnp.exp(s)
    p = p * pl.reciprocal(jnp.sum(p, axis=-1, keepdims=True), approx=True)
    # dropout(p=0.0) is the identity.

    # ---- weighted sum of values ----
    out = jnp.einsum("bqk,bkd->bqd",
                     p.astype(jnp.bfloat16), v.astype(jnp.bfloat16),
                     preferred_element_type=jnp.float32)
    o_ref[...] = out.astype(o_ref.dtype)


def head_forward(x, wq, wk, wv):
    """x: (B, T, C); wq/wk/wv: (C, head_size). Returns (B, T, head_size)."""
    B, T, C = x.shape
    head_size = wq.shape[1]
    wqkv = jnp.concatenate([wq, wk, wv], axis=1)      # host-side QKV fusion

    kernel = functools.partial(head_kernel, head_size=head_size)
    return pl.pallas_call(
        kernel,
        out_shape=jax.ShapeDtypeStruct((B, T, head_size), jnp.float32),
        grid=(1,),  # whole problem fits comfortably in VMEM -> single step
        in_specs=[pl.BlockSpec((B, T, C), lambda i: (0, 0, 0)),
                  pl.BlockSpec((C, 3 * head_size), lambda i: (0, 0))],
        out_specs=pl.BlockSpec((B, T, head_size), lambda i: (0, 0, 0)),
        compiler_params=pltpu.CompilerParams(
            dimension_semantics=("arbitrary",)),
    )(x, wqkv)


def head_reference(x, wq, wk, wv):
    """Pure-JAX reference matching the PyTorch Head forward (eval mode)."""
    q = x @ wq
    k = x @ wk
    v = x @ wv
    T = x.shape[1]
    hs = wq.shape[1]
    s = jnp.einsum("bqd,bkd->bqk", q, k) * hs ** -0.5
    mask = jnp.tril(jnp.ones((T, T), dtype=bool))
    s = jnp.where(mask[None], s, -jnp.inf)
    p = jax.nn.softmax(s, axis=-1)
    return jnp.einsum("bqk,bkd->bqd", p, v)


if __name__ == "__main__":
    batch = 2
    context = 8          # sequence length T
    n_embed = 32
    head_size = 16
    dropout = 0.0        # identity (eval semantics)

    key = jax.random.PRNGKey(0)
    kx, kq, kk, kv = jax.random.split(key, 4)
    bound = n_embed ** -0.5   # nn.Linear-style init scale
    x = jax.random.normal(kx, (batch, context, n_embed), jnp.float32)
    wq = jax.random.uniform(kq, (n_embed, head_size), jnp.float32, -bound, bound)
    wk = jax.random.uniform(kk, (n_embed, head_size), jnp.float32, -bound, bound)
    wv = jax.random.uniform(kv, (n_embed, head_size), jnp.float32, -bound, bound)

    fwd = jax.jit(head_forward)
    out = fwd(x, wq, wk, wv)
    jax.block_until_ready(out)

    assert out.shape == (batch, context, head_size)
    ref = head_reference(x, wq, wk, wv)
    max_err = float(jnp.max(jnp.abs(out - ref)))
    assert jnp.allclose(out, ref, atol=5e-2, rtol=5e-2), max_err
    print("KERNEL_OK")
</pallas_src>

<mosaic_0001>
module attributes {stable_mosaic.version = 11 : i64} {
  func.func @head_kernel(%arg0: i32, %arg1: memref<2x8x32xf32, #tpu.memory_space<vmem>>, %arg2: memref<32x48xf32, #tpu.memory_space<vmem>>, %arg3: memref<2x8x16xf32, #tpu.memory_space<vmem>>) attributes {dimension_semantics = [#tpu.dimension_semantics<arbitrary>], iteration_bounds = array<i64: 1>, scalar_prefetch = 0 : i64, scratch_operands = 0 : i64, tpu.core_type = #tpu.core_type<tc>, window_params = [{pipeline_mode = #tpu.pipeline_mode<synchronous>, transform_indices = @transform_0, window_bounds = array<i64: 2, 8, 32>}, {pipeline_mode = #tpu.pipeline_mode<synchronous>, transform_indices = @transform_1, window_bounds = array<i64: 32, 48>}, {pipeline_mode = #tpu.pipeline_mode<synchronous>, transform_indices = @transform_2, window_bounds = array<i64: 2, 8, 16>}]} {
    %c0 = arith.constant 0 : index
    %c0_0 = arith.constant 0 : index
    %c0_1 = arith.constant 0 : index
    %0 = vector.load %arg1[%c0, %c0_0, %c0_1] : memref<2x8x32xf32, #tpu.memory_space<vmem>>, vector<2x8x32xf32>
    %1 = vector.shape_cast %0 : vector<2x8x32xf32> to vector<16x32xf32>
    %2 = arith.truncf %1 : vector<16x32xf32> to vector<16x32xbf16>
    %c0_2 = arith.constant 0 : index
    %c0_3 = arith.constant 0 : index
    %3 = vector.load %arg2[%c0_2, %c0_3] : memref<32x48xf32, #tpu.memory_space<vmem>>, vector<32x48xf32>
    %4 = arith.truncf %3 : vector<32x48xf32> to vector<32x48xbf16>
    %cst = arith.constant dense<0.000000e+00> : vector<16x48xf32>
    %5 = tpu.matmul %2, %4, %cst {dimension_numbers = #tpu.dot_dimension_numbers<[1], [0], [0], [1], [0, 0, 1, 1], [], []>} : vector<16x32xbf16>, vector<32x48xbf16>, vector<16x48xf32> -> vector<16x48xf32>
    %6 = vector.shape_cast %5 : vector<16x48xf32> to vector<2x8x48xf32>
    %7 = vector.extract_strided_slice %6 {offsets = [0, 0, 0], sizes = [2, 8, 16], strides = [1, 1, 1]} : vector<2x8x48xf32> to vector<2x8x16xf32>
    %8 = vector.extract_strided_slice %6 {offsets = [0, 0, 16], sizes = [2, 8, 16], strides = [1, 1, 1]} : vector<2x8x48xf32> to vector<2x8x16xf32>
    %9 = vector.extract_strided_slice %6 {offsets = [0, 0, 32], sizes = [2, 8, 16], strides = [1, 1, 1]} : vector<2x8x48xf32> to vector<2x8x16xf32>
    %10 = arith.truncf %7 : vector<2x8x16xf32> to vector<2x8x16xbf16>
    %11 = arith.truncf %8 : vector<2x8x16xf32> to vector<2x8x16xbf16>
    "tpu.trace_start"() <{level = 10 : i32, message = "bqd,bkd->bqk"}> : () -> ()
    %cst_4 = arith.constant dense<0.000000e+00> : vector<2x8x8xf32>
    %12 = tpu.matmul %10, %11, %cst_4 {dimension_numbers = #tpu.dot_dimension_numbers<[2], [2], [1], [1], [0, 0, 0, 1, 1, 1], [0], [0]>} : vector<2x8x16xbf16>, vector<2x8x16xbf16>, vector<2x8x8xf32> -> vector<2x8x8xf32>
    "tpu.trace_stop"() : () -> ()
    %cst_5 = arith.constant 2.500000e-01 : f32
    %13 = vector.broadcast %cst_5 : f32 to vector<2x8x8xf32>
    %14 = arith.mulf %12, %13 : vector<2x8x8xf32>
    %15 = tpu.iota {dimensions = array<i32: 0>} : vector<8x8xi32>
    %16 = tpu.iota {dimensions = array<i32: 1>} : vector<8x8xi32>
    %17 = arith.cmpi sge, %15, %16 : vector<8x8xi32>
    %18 = vector.shape_cast %17 : vector<8x8xi1> to vector<1x8x8xi1>
    %cst_6 = arith.constant -1.000000e+30 : f32
    %19 = vector.shape_cast %18 : vector<1x8x8xi1> to vector<1x8x8xi1>
    %20 = vector.broadcast %19 : vector<1x8x8xi1> to vector<2x8x8xi1>
    %21 = vector.broadcast %cst_6 : f32 to vector<2x8x8xf32>
    %22 = arith.select %20, %14, %21 : vector<2x8x8xi1>, vector<2x8x8xf32>
    %cst_7 = arith.constant dense<0xFF800000> : vector<2x8xf32>
    %23 = vector.multi_reduction <maximumf>, %22, %cst_7 [2] : vector<2x8x8xf32> to vector<2x8xf32>
    %24 = vector.shape_cast %23 : vector<2x8xf32> to vector<2x8x1xf32>
    %25 = vector.broadcast %24 : vector<2x8x1xf32> to vector<2x8x8xf32>
    %26 = arith.subf %22, %25 : vector<2x8x8xf32>
    %27 = math.exp %26 : vector<2x8x8xf32>
    %cst_8 = arith.constant dense<0.000000e+00> : vector<2x8xf32>
    %28 = vector.multi_reduction <add>, %27, %cst_8 [2] : vector<2x8x8xf32> to vector<2x8xf32>
    %29 = vector.shape_cast %28 : vector<2x8xf32> to vector<2x8x1xf32>
    %30 = tpu.reciprocal %29 {approx = true} : vector<2x8x1xf32> -> vector<2x8x1xf32>
    %31 = vector.broadcast %30 : vector<2x8x1xf32> to vector<2x8x8xf32>
    %32 = arith.mulf %27, %31 : vector<2x8x8xf32>
    %33 = arith.truncf %32 : vector<2x8x8xf32> to vector<2x8x8xbf16>
    %34 = arith.truncf %9 : vector<2x8x16xf32> to vector<2x8x16xbf16>
    "tpu.trace_start"() <{level = 10 : i32, message = "bqk,bkd->bqd"}> : () -> ()
    %cst_9 = arith.constant dense<0.000000e+00> : vector<2x8x16xf32>
    %35 = tpu.matmul %33, %34, %cst_9 {dimension_numbers = #tpu.dot_dimension_numbers<[2], [1], [1], [2], [0, 0, 0, 1, 1, 2], [0], [0]>} : vector<2x8x8xbf16>, vector<2x8x16xbf16>, vector<2x8x16xf32> -> vector<2x8x16xf32>
    "tpu.trace_stop"() : () -> ()
    %c0_10 = arith.constant 0 : index
    %c0_11 = arith.constant 0 : index
    %c0_12 = arith.constant 0 : index
    %36 = vector.load %arg3[%c0_10, %c0_11, %c0_12] : memref<2x8x16xf32, #tpu.memory_space<vmem>>, vector<2x8x16xf32>
    tpu.vector_store %arg3[%c0_10, %c0_11, %c0_12], %35 {strides = array<i32>} : memref<2x8x16xf32, #tpu.memory_space<vmem>>, vector<2x8x16xf32>,
    return
  }
  func.func @transform_0(%arg0: i32) -> (i32, i32, i32) {
    %c0_i32 = arith.constant 0 : i32
    %c0_i32_0 = arith.constant 0 : i32
    %c0_i32_1 = arith.constant 0 : i32
    %c0_i32_2 = arith.constant 0 : i32
    return %c0_i32, %c0_i32_0, %c0_i32_1 : i32, i32, i32
  }
  func.func @transform_1(%arg0: i32) -> (i32, i32) {
    %c0_i32 = arith.constant 0 : i32
    %c0_i32_0 = arith.constant 0 : i32
    %c0_i32_1 = arith.constant 0 : i32
    return %c0_i32, %c0_i32_0 : i32, i32
  }
  func.func @transform_2(%arg0: i32) -> (i32, i32, i32) {
    %c0_i32 = arith.constant 0 : i32
    %c0_i32_0 = arith.constant 0 : i32
    %c0_i32_1 = arith.constant 0 : i32
    %c0_i32_2 = arith.constant 0 : i32
    return %c0_i32, %c0_i32_0, %c0_i32_1 : i32, i32, i32
  }
}

</mosaic_0001>

<bundles_post_ra>
// kernel: head_forward.1
= control target key start
LH: loop header
LB: loop body
LE: loop exit
PB: predicated region body
PF: predicated region fallthrough
CT: control target
= control target key end

     0   :  { %v406_v3 = vmov 0.0   ;;  %vm407_vm0 = vmmov 0   ;;  %s477_s0 = inlined_call_operand.vmem [shape: f32[2,8,32], index: 0, kind: input, shape index: {}]   ;;  %s478_s1 = inlined_call_operand.vmem [shape: f32[32,48], index: 1, kind: input, shape index: {}]   ;;  %s479_s2 = inlined_call_operand.hbm [shape: f32[2,8,16], index: 2, kind: output, shape index: {}]  }
   0x1   :  { %v16_v0 = vld [vmem:[%s478_s1] sm:$0xff]  ;;  %v17_v1 = vld [vmem:[%s478_s1 + $0x8] sm:$0xff]  ;;  %v18_v2 = vld [vmem:[%s478_s1 + $0x10] sm:$0xff]  ;;  %335 = vmatprep.subr.bf16.mxu0 %v406_v3  ;;  %339 = vmatprep.mubr.msk.bf16.mxu0 %vm407_vm0, %v406_v3 }
   0x2   :  { %v20_v4 = vpack.c.bf16 %v17_v1, %v16_v0  ;;  %v19_v5 = vld [vmem:[%s478_s1 + $0x18] sm:$0xff]  ;;  %343 = vmatprep.subr.bf16.mxu1 %v406_v3  ;;  %345 = vmatprep.mubr.msk.bf16.mxu1 %vm407_vm0, %v406_v3 }
   0x3   :  { %7 = vsyncpa [#allocation3], 0  ;;  %v21_v6 = vpack.c.bf16 %v19_v5, %v18_v2  ;;  %v13_v7 = vld [vmem:[%s477_s0] sm:$0xff]  ;;  %v14_v8 = vld [vmem:[%s477_s0 + $0x8] sm:$0xff]  ;;  %vm22_vm1 = vcmask 261120   ;;  %s408_s1 = smov 112   ;;  %v170_v20 = vlaneseq }
   0x4   :  { %336 = vmatpush3.bf16.msra.mxu0 %v20_v4  ;;  %v15_v9 = vpack.c.bf16 %v14_v8, %v13_v7  ;;  %vm72_vm2 = vcmask 130048   ;;  %vm179_vm4 = vcmask 64512   ;;  %s409_s0 = smov 96   ;;  %vm209_vm5 = vcmask 1043456   ;;  %s410_s21 = smov [#allocation2]  }
   0x5   :  { %337 = vmatprep.subr.bf16.mxu0 %v406_v3  ;;  %v171_v21 = vshrl.u32 %v170_v20, 7  ;;  %v173_v22 = vand.u32 127, %v170_v20  ;;  %s308_s22 = sshll.u32 %s410_s21, 4  ;;  %s309_s22 = int_to_ptr.vmem [resolvable:$true] %s308_s22 }
   0x6   :  { %s382_s23 = scalar_lea.vmem %s309_s22, 256  ;;  %p387_p1 = scmp.lt.s32.totalorder %s309_s22, %s309_s22 }
   0x7   :  { %vm174_vm3 = vcmp.ge.s32.totalorder %v171_v21, %v173_v22  ;;  %p383_p0 = scmp.ne.s32.totalorder %s309_s22, %s382_s23  ;;  %p388_p2 = scmp.lt.s32.totalorder %s382_s23, %s382_s23 }
   0x8   :  { %338 = vmatpush3.bf16.msra.mxu0 %v21_v6 }
   0x9   :  { %349 = vmatprep.subr.bf16.mxu0 %v406_v3  ;;  %p389_p3 = por %p388_p2, %p387_p1 }
   0xb   :  { %340 = vmatmul.mubr.msk.bf16.vlgmr.msra.gmra.mrb[0].mxu0 %vm22_vm1, %v15_v9  ;;  %p390_p4 = pnand %p389_p3, %p383_p0 }
   0xc   :  { %351 = vmatprep.mubr.msk.bf16.mxu0 %vm407_vm0, %v406_v3 }
  0xde   :  { %v60_v10 = vpop.f32.mrb[0].mxu0 }
  0xdf   :  { %v67_v11 = vpack.c.bf16 %v60_v10, %v60_v10  ;;  %v341_v12 = vpop.f32.mrb[1].mxu0 }
  0xe0   :  { %v63_v13 = vpop.f32.mrb[2].mxu0 }
  0xe1   :  { %70 = vrot.lane.b32.xlu0 %v67_v11, %s408_s1  ;;  %v342_v14 = vpop.f32.mrb[3].mxu0  ;;  %v68_v15 = vpack.c.bf16 %v63_v13, %v63_v13 }
  0xe5   :  { %120 = vrot.lane.b32.xlu0 %v68_v15, %s408_s1 }
 0x153   :  { %v71_v16 = vpop.permute.xlu0 %70 }
 0x154   :  { %v77_v17 = vsel %vm72_vm2, %v71_v16, 0 }
 0x155   :  { %344 = vmatpush3.bf16.xpose.msra.mxu1 %v77_v17 }
 0x156   :  { %355 = vmatprep.subr.bf16.mxu1 %v406_v3 }
 0x157   :  { %v121_v18 = vpop.permute.xlu0 %120 }
 0x158   :  { %v126_v19 = vsel %vm72_vm2, %v121_v18, 0 }
 0x159   :  { %350 = vmatpush3.bf16.xpose.msra.mxu0 %v126_v19 }
 0x15a   :  { %361 = vmatprep.subr.bf16.mxu0 %v406_v3 }
 0x15c   :  { %346 = vmatmul.mubr.msk.bf16.vlgmr.msra.gmra.mrb[0].mxu1 %vm72_vm2, %v67_v11 }
 0x15d   :  { %357 = vmatprep.mubr.msk.bf16.mxu1 %vm407_vm0, %v406_v3 }
 0x160   :  { %352 = vmatmul.mubr.msk.bf16.vlgmr.msra.gmra.mrb[4].mxu0 %vm72_vm2, %v68_v15 }
 0x161   :  { %363 = vmatprep.mubr.msk.bf16.mxu0 %vm407_vm0, %v406_v3 }
 0x22f   :  { %v113_v23 = vpop.f32.mrb[0].mxu1 }
 0x230   :  { %v168_v24 = vmul.f32 0.25, %v113_v23  ;;  %v347_v25 = vpop.f32.mrb[1].mxu1 }
 0x231   :  { %v116_v26 = vpop.f32.mrb[2].mxu1 }
 0x232   :  { %v348_v27 = vpop.f32.mrb[3].mxu1  ;;  %v177_v28 = vsel %vm174_vm3, %v168_v24, -1e+30 }
 0x233   :  { %v162_v29 = vpop.f32.mrb[4].mxu0  ;;  %v180_v30 = vsel %vm179_vm4, %v177_v28, -inf }
 0x234   :  { %v169_v31 = vmul.f32 0.25, %v162_v29  ;;  %181 = vmax.xlane.f32.xlu1 %v180_v30  ;;  %v353_v32 = vpop.f32.mrb[5].mxu0 }
 0x235   :  { %v165_v33 = vpop.f32.mrb[6].mxu0 }
 0x236   :  { %v354_v34 = vpop.f32.mrb[7].mxu0  ;;  %v178_v35 = vsel %vm174_vm3, %v169_v31, -1e+30 }
 0x237   :  { %v183_v36 = vsel %vm179_vm4, %v178_v35, -inf }
 0x238   :  { %184 = vmax.xlane.f32.xlu1 %v183_v36 }
 0x249   :  { %204 = vrot.lane.b32.xlu1 %v67_v11, %s409_s0 }
 0x2c1   :  { %v182_v37 = vpop.xlane.xlu1 %181 }
 0x2c2   :  { %v186_v38 = vsub.f32 %v177_v28, %v182_v37 }
 0x2c4   :  { %v188_v39 = vmul.f32 1.442695, %v186_v38 }
 0x2c5   :  { %v185_v40 = vpop.xlane.xlu1 %184 }
 0x2c6   :  { %374 = vpow2.f32 %v188_v39  ;;  %v187_v41 = vsub.f32 %v178_v35, %v185_v40 }
 0x2c8   :  { %v190_v42 = vmul.f32 1.442695, %v187_v41 }
 0x2c9   :  { %v205_v43 = vpop.permute.xlu1 %204 }
 0x2ca   :  { %376 = vpow2.f32 %v190_v42  ;;  %v211_v44 = vsel %vm209_vm5, %v205_v43, 0 }
 0x2cb   :  { %356 = vmatpush3.bf16.msra.mxu1 %v211_v44 }
 0x2d0   :  { %v375_v45 = vpop.eup %374 }
 0x2d1   :  { %v192_v46 = vsel %vm179_vm4, %v375_v45, 0.0 }
 0x2d2   :  { %193 = vadd.xlane.f32.xlu0 %v192_v46 }
 0x2d4   :  { %v377_v47 = vpop.eup %376 }
 0x2d5   :  { %v195_v48 = vsel %vm179_vm4, %v377_v47, 0.0 }
 0x2d6   :  { %196 = vadd.xlane.f32.xlu1 %v195_v48 }
 0x2e7   :  { %253 = vrot.lane.b32.xlu1 %v68_v15, %s409_s0 }
 0x35f   :  { %v194_v49 = vpop.xlane.xlu0 %193 }
 0x360   :  { %378 = vrcp.f32 %v194_v49 }
 0x363   :  { %v197_v50 = vpop.xlane.xlu1 %196 }
 0x364   :  { %380 = vrcp.f32 %v197_v50 }
 0x367   :  { %v254_v51 = vpop.permute.xlu1 %253 }
 0x368   :  { %v259_v52 = vsel %vm209_vm5, %v254_v51, 0 }
 0x369   :  { %362 = vmatpush3.bf16.msra.mxu0 %v259_v52 }
 0x36a   :  { %v379_v53 = vpop.eup %378 }
 0x36b   :  { %v200_v54 = vmul.f32 %v379_v53, %v375_v45 }
 0x36d   :  { %v202_v55 = vpack.c.bf16 %v200_v54, %v200_v54 }
 0x36e   :  { %v381_v56 = vpop.eup %380 }
 0x36f   :  { %v201_v57 = vmul.f32 %v381_v56, %v377_v47  ;;  %358 = vmatmul.mubr.msk.bf16.vlgmr.msra.gmra.mrb[4].mxu1 %vm179_vm4, %v202_v55 }
 0x371   :  { %v203_v58 = vpack.c.bf16 %v201_v57, %v201_v57 }
 0x373   :  { %364 = vmatmul.mubr.msk.bf16.vlgmr.msra.gmra.mrb[8].mxu0 %vm179_vm4, %v203_v58 }
 0x442   :  { %v247_v59 = vpop.f32.mrb[4].mxu1 }
 0x443   :  { %301 = vst.msk [vmem:[#allocation2] sm:$0xff] %vm72_vm2, %v247_v59  ;;  %v359_v60 = vpop.f32.mrb[5].mxu1 }
 0x444   :  { %v250_v61 = vpop.f32.mrb[6].mxu1 }
 0x445   :  { %v360_v62 = vpop.f32.mrb[7].mxu1 }
 0x446   :  { %v295_v63 = vpop.f32.mrb[8].mxu0 }
 0x447   :  { %302 = vst.msk [vmem:[#allocation2 + $0x8] sm:$0xff] %vm72_vm2, %v295_v63  ;;  %v365_v0 = vpop.f32.mrb[9].mxu0 }
 0x448   :  { %v298_v1 = vpop.f32.mrb[10].mxu0 }
 0x449   :  { %393 = shalt.err (!%p390_p4)
}
 0x44a   :  { %s394_s26 = scalar_lea.hbm %s479_s2, 256 }
 0x44b   :  { %p395_p5 = scmp.ne.s32.totalorder %s479_s2, %s394_s26  ;;  %p398_p6 = scmp.lt.u32.totalorder %s394_s26, %s479_s2 }
 0x44d   :  { %p400_p7 = pnand %p398_p6, %p395_p5 }
 0x44f   :  { %403 = shalt.err (!%p400_p7)
}
 0x450   :  { %s411_s3 = smov 128   ;;  %s412_s4 = smov 8   ;;  %v366_v2 = vpop.f32.mrb[11].mxu0 }
 0x451   :  { %314 = dma.vmem_to_hbm [thread:$0]  %s309_s22, 256, %s479_s2, [#allocation3], %s411_s3, %s411_s3, %s412_s4  }
 0x452   :  { %404 = dma.done.wait [#allocation3], 256  }
 0x453   :  { %405 = vsyncadd [#allocation3], 4294967040 }
 0x454   :  { %318 = vsyncpa [#allocation3], 1 }

</bundles_post_ra>
